<compile_context>
chip_gen: v7x
topology: tpu7x:2x2x1
jax: 0.10.0
libtpu: 0.0.40
codegen_flags: <defaults>
</compile_context>

<pallas_src>
import jax
import jax.numpy as jnp
from jax.experimental import pallas as pl
from jax.experimental.pallas import tpu as pltpu

LANES = 128


def _counter_kernel(pred_ref, tgt_ref, out_ref):
    # pred_ref: (1, C, S, 128) scores (native dtype)
    # tgt_ref:  (1, 1, S, 128) int8 targets (spatial padding filled with 4)
    # out_ref:  (1, 1, 4, 128) int32 partial counts, resident across the tile axis
    j = pl.program_id(2)

    @pl.when(j == 0)
    def _init():
        out_ref[...] = jnp.zeros_like(out_ref)

    num_classes = pred_ref.shape[1]
    t = tgt_ref[0, 0].astype(jnp.int32)          # (S, 128)

    # First-occurrence argmax restricted to classes {0, 1} (all we need).
    x0 = pred_ref[0, 0]                           # (S, 128)
    if num_classes > 1:
        x1 = pred_ref[0, 1]
        pred0 = x0 >= x1                          # class 0 is a (first) max
        pred1 = x1 > x0                           # class 1 strictly beats 0 ...
        for c in range(2, num_classes):
            xc = pred_ref[0, c]
            pred0 = pred0 & (x0 >= xc)
            pred1 = pred1 & (x1 >= xc)            # ... and ties/beats the rest
    else:
        pred0 = jnp.ones_like(t, dtype=jnp.bool_)
        pred1 = jnp.zeros_like(t, dtype=jnp.bool_)

    c0 = (pred0 & (t == 0)).astype(jnp.int32)
    c1 = (pred1 & (t == 1)).astype(jnp.int32)
    c2 = (pred0 & (t == 2)).astype(jnp.int32)
    c3 = (pred1 & (t == 3)).astype(jnp.int32)

    # Sublane reduce each counter to a single lane-dense row, one (4,128) add.
    upd = jnp.concatenate(
        [c0.sum(axis=0, keepdims=True),
         c1.sum(axis=0, keepdims=True),
         c2.sum(axis=0, keepdims=True),
         c3.sum(axis=0, keepdims=True)],
        axis=0)                                   # (4, 128) int32

    out_ref[0, 0] = out_ref[0, 0] + upd


def four_class_counter(pred_score, target):
    """pred_score: (N, C, ...) scores; target: (N, ...) int. Returns 4 int32 scalars."""
    n = pred_score.shape[0]
    c = pred_score.shape[1]
    hw = 1
    for d in pred_score.shape[2:]:
        hw *= d

    itemsize = jnp.dtype(pred_score.dtype).itemsize
    rows = pl.cdiv(hw, LANES)                     # sublane rows covering hw

    # Rows per step: multiple of 32 (valid sublane tiling for f32/bf16 pred and
    # int8 target), sized for ~2 MiB of pred per block, capped at 1024 rows so
    # double-buffered blocks + intermediates stay well under 16 MiB scoped VMEM.
    row_bytes = c * LANES * itemsize
    s = (2 * 1024 * 1024) // max(row_bytes, 1)
    s = max(32, min(1024, (s // 32) * 32))
    s = min(s, ((rows + 31) // 32) * 32)

    num_tiles = pl.cdiv(rows, s)
    # Split the tile axis into (parallel P, arbitrary inner) so both v7x
    # TensorCores have work even when n == 1.
    p = 2 if (num_tiles >= 2 and num_tiles % 2 == 0) else 1
    inner = num_tiles // p

    rows_pad = num_tiles * s
    hw_pad = rows_pad * LANES

    pred3 = pred_score.reshape(n, c, hw)
    tgt2 = target.reshape(n, hw)
    if hw_pad != hw:
        pred3 = jnp.pad(pred3, ((0, 0), (0, 0), (0, hw_pad - hw)))
        # Fill padded pixels with 4 (outside {0..3}) so they never count.
        tgt2 = jnp.pad(tgt2, ((0, 0), (0, hw_pad - hw)), constant_values=4)
    pred4 = pred3.reshape(n, c, rows_pad, LANES)
    tgt4 = tgt2.astype(jnp.int8).reshape(n, 1, rows_pad, LANES)

    def data_idx(i, pi, ji):
        return (i, 0, pi * inner + ji, 0)

    def out_idx(i, pi, ji):
        return (i, pi, 0, 0)

    partials = pl.pallas_call(
        _counter_kernel,
        out_shape=jax.ShapeDtypeStruct((n, p, 4, LANES), jnp.int32),
        grid=(n, p, inner),
        in_specs=[
            pl.BlockSpec((1, c, s, LANES), data_idx),
            pl.BlockSpec((1, 1, s, LANES), data_idx),
        ],
        out_specs=pl.BlockSpec((1, 1, 4, LANES), out_idx),
        compiler_params=pltpu.CompilerParams(
            dimension_semantics=("parallel", "parallel", "arbitrary")),
    )(pred4, tgt4)

    # Tiny final reduce over lanes / parallel chunks / batch.
    counts = jnp.sum(partials, axis=(0, 1, 3))    # (4,) int32
    return counts[0], counts[1], counts[2], counts[3]


def _reference(pred_score, target):
    pred = jnp.argmax(pred_score, axis=1).astype(jnp.int32)
    t = target.astype(jnp.int32)
    zero = jnp.sum((pred == 0) & (t == 0))
    one = jnp.sum((pred == 1) & (t == 1))
    two = jnp.sum((pred == 0) & (t == 2))
    three = jnp.sum((pred == 1) & (t == 3))
    return zero, one, two, three


if __name__ == "__main__":
    key = jax.random.PRNGKey(0)
    k1, k2 = jax.random.split(key)

    N, C, H, W = 2, 4, 16, 16
    pred_score = jax.random.normal(k1, (N, C, H, W), dtype=jnp.float32)
    target = jax.random.randint(k2, (N, H, W), minval=0, maxval=4, dtype=jnp.int32)

    out = four_class_counter(pred_score, target)
    out = jax.block_until_ready(out)

    ref = _reference(pred_score, target)
    for got, want in zip(out, ref):
        assert int(got) == int(want), (int(got), int(want))

    print("KERNEL_OK")
</pallas_src>

<mosaic_0001>
module attributes {stable_mosaic.version = 11 : i64} {
  func.func @_counter_kernel(%arg0: i32, %arg1: i32, %arg2: i32, %arg3: memref<1x4x32x128xf32, #tpu.memory_space<vmem>>, %arg4: memref<1x1x32x128xi8, #tpu.memory_space<vmem>>, %arg5: memref<1x1x4x128xi32, #tpu.memory_space<vmem>>) attributes {dimension_semantics = [#tpu.dimension_semantics<parallel>, #tpu.dimension_semantics<parallel>, #tpu.dimension_semantics<arbitrary>], iteration_bounds = array<i64: 2, 1, 1>, scalar_prefetch = 0 : i64, scratch_operands = 0 : i64, tpu.core_type = #tpu.core_type<tc>, window_params = [{transform_indices = @transform_0, window_bounds = array<i64: 1, 4, 32, 128>}, {transform_indices = @transform_1, window_bounds = array<i64: 1, 1, 32, 128>}, {transform_indices = @transform_2, window_bounds = array<i64: 1, 1, 4, 128>}]} {
    %c0_i32 = arith.constant 0 : i32
    %0 = arith.cmpi eq, %arg2, %c0_i32 : i32
    %1 = arith.extui %0 : i1 to i32
    %c0_i32_0 = arith.constant 0 : i32
    %2 = arith.cmpi ne, %1, %c0_i32_0 : i32
    scf.if %2 {
      %c0_i32_29 = arith.constant 0 : i32
      %55 = vector.broadcast %c0_i32_29 : i32 to vector<1x1x4x128xi32>
      %c0_30 = arith.constant 0 : index
      %c0_31 = arith.constant 0 : index
      %c0_32 = arith.constant 0 : index
      %c0_33 = arith.constant 0 : index
      %56 = vector.load %arg5[%c0_30, %c0_31, %c0_32, %c0_33] : memref<1x1x4x128xi32, #tpu.memory_space<vmem>>, vector<1x1x4x128xi32>
      tpu.vector_store %arg5[%c0_30, %c0_31, %c0_32, %c0_33], %55 {strides = array<i32>} : memref<1x1x4x128xi32, #tpu.memory_space<vmem>>, vector<1x1x4x128xi32>,
    } else {
    }
    %c0 = arith.constant 0 : index
    %c0_1 = arith.constant 0 : index
    %c0_2 = arith.constant 0 : index
    %c0_3 = arith.constant 0 : index
    %3 = vector.load %arg4[%c0, %c0_1, %c0_2, %c0_3] : memref<1x1x32x128xi8, #tpu.memory_space<vmem>>, vector<1x1x32x128xi8>
    %4 = vector.shape_cast %3 : vector<1x1x32x128xi8> to vector<32x128xi8>
    %5 = arith.extsi %4 : vector<32x128xi8> to vector<32x128xi32>
    %c0_4 = arith.constant 0 : index
    %c0_5 = arith.constant 0 : index
    %c0_6 = arith.constant 0 : index
    %c0_7 = arith.constant 0 : index
    %6 = vector.load %arg3[%c0_4, %c0_5, %c0_6, %c0_7] : memref<1x4x32x128xf32, #tpu.memory_space<vmem>>, vector<1x1x32x128xf32>
    %7 = vector.shape_cast %6 : vector<1x1x32x128xf32> to vector<32x128xf32>
    %c0_8 = arith.constant 0 : index
    %c1 = arith.constant 1 : index
    %c0_9 = arith.constant 0 : index
    %c0_10 = arith.constant 0 : index
    %8 = vector.load %arg3[%c0_8, %c1, %c0_9, %c0_10] : memref<1x4x32x128xf32, #tpu.memory_space<vmem>>, vector<1x1x32x128xf32>
    %9 = vector.shape_cast %8 : vector<1x1x32x128xf32> to vector<32x128xf32>
    %10 = arith.cmpf oge, %7, %9 : vector<32x128xf32>
    %11 = arith.cmpf ogt, %9, %7 : vector<32x128xf32>
    %c0_11 = arith.constant 0 : index
    %c2 = arith.constant 2 : index
    %c0_12 = arith.constant 0 : index
    %c0_13 = arith.constant 0 : index
    %12 = vector.load %arg3[%c0_11, %c2, %c0_12, %c0_13] : memref<1x4x32x128xf32, #tpu.memory_space<vmem>>, vector<1x1x32x128xf32>
    %13 = vector.shape_cast %12 : vector<1x1x32x128xf32> to vector<32x128xf32>
    %14 = arith.cmpf oge, %7, %13 : vector<32x128xf32>
    %15 = arith.andi %10, %14 : vector<32x128xi1>
    %16 = arith.cmpf oge, %9, %13 : vector<32x128xf32>
    %17 = arith.andi %11, %16 : vector<32x128xi1>
    %c0_14 = arith.constant 0 : index
    %c3 = arith.constant 3 : index
    %c0_15 = arith.constant 0 : index
    %c0_16 = arith.constant 0 : index
    %18 = vector.load %arg3[%c0_14, %c3, %c0_15, %c0_16] : memref<1x4x32x128xf32, #tpu.memory_space<vmem>>, vector<1x1x32x128xf32>
    %19 = vector.shape_cast %18 : vector<1x1x32x128xf32> to vector<32x128xf32>
    %20 = arith.cmpf oge, %7, %19 : vector<32x128xf32>
    %21 = arith.andi %15, %20 : vector<32x128xi1>
    %22 = arith.cmpf oge, %9, %19 : vector<32x128xf32>
    %23 = arith.andi %17, %22 : vector<32x128xi1>
    %c0_i32_17 = arith.constant 0 : i32
    %24 = vector.broadcast %c0_i32_17 : i32 to vector<32x128xi32>
    %25 = arith.cmpi eq, %5, %24 : vector<32x128xi32>
    %26 = arith.andi %21, %25 : vector<32x128xi1>
    %27 = arith.extui %26 : vector<32x128xi1> to vector<32x128xi32>
    %c1_i32 = arith.constant 1 : i32
    %28 = vector.broadcast %c1_i32 : i32 to vector<32x128xi32>
    %29 = arith.cmpi eq, %5, %28 : vector<32x128xi32>
    %30 = arith.andi %23, %29 : vector<32x128xi1>
    %31 = arith.extui %30 : vector<32x128xi1> to vector<32x128xi32>
    %c2_i32 = arith.constant 2 : i32
    %32 = vector.broadcast %c2_i32 : i32 to vector<32x128xi32>
    %33 = arith.cmpi eq, %5, %32 : vector<32x128xi32>
    %34 = arith.andi %21, %33 : vector<32x128xi1>
    %35 = arith.extui %34 : vector<32x128xi1> to vector<32x128xi32>
    %c3_i32 = arith.constant 3 : i32
    %36 = vector.broadcast %c3_i32 : i32 to vector<32x128xi32>
    %37 = arith.cmpi eq, %5, %36 : vector<32x128xi32>
    %38 = arith.andi %23, %37 : vector<32x128xi1>
    %39 = arith.extui %38 : vector<32x128xi1> to vector<32x128xi32>
    %cst = arith.constant dense<0> : vector<128xi32>
    %40 = vector.multi_reduction <add>, %27, %cst [0] : vector<32x128xi32> to vector<128xi32>
    %41 = vector.shape_cast %40 : vector<128xi32> to vector<1x128xi32>
    %cst_18 = arith.constant dense<0> : vector<128xi32>
    %42 = vector.multi_reduction <add>, %31, %cst_18 [0] : vector<32x128xi32> to vector<128xi32>
    %43 = vector.shape_cast %42 : vector<128xi32> to vector<1x128xi32>
    %cst_19 = arith.constant dense<0> : vector<128xi32>
    %44 = vector.multi_reduction <add>, %35, %cst_19 [0] : vector<32x128xi32> to vector<128xi32>
    %45 = vector.shape_cast %44 : vector<128xi32> to vector<1x128xi32>
    %cst_20 = arith.constant dense<0> : vector<128xi32>
    %46 = vector.multi_reduction <add>, %39, %cst_20 [0] : vector<32x128xi32> to vector<128xi32>
    %47 = vector.shape_cast %46 : vector<128xi32> to vector<1x128xi32>
    %48 = tpu.concatenate %41, %43, %45, %47 in 0 : vector<1x128xi32>, vector<1x128xi32>, vector<1x128xi32>, vector<1x128xi32> -> vector<4x128xi32>
    %c0_21 = arith.constant 0 : index
    %c0_22 = arith.constant 0 : index
    %c0_23 = arith.constant 0 : index
    %c0_24 = arith.constant 0 : index
    %49 = vector.load %arg5[%c0_21, %c0_22, %c0_23, %c0_24] : memref<1x1x4x128xi32, #tpu.memory_space<vmem>>, vector<1x1x4x128xi32>
    %50 = vector.shape_cast %49 : vector<1x1x4x128xi32> to vector<4x128xi32>
    %51 = arith.addi %50, %48 : vector<4x128xi32>
    %c0_25 = arith.constant 0 : index
    %c0_26 = arith.constant 0 : index
    %c0_27 = arith.constant 0 : index
    %c0_28 = arith.constant 0 : index
    %52 = vector.load %arg5[%c0_25, %c0_26, %c0_27, %c0_28] : memref<1x1x4x128xi32, #tpu.memory_space<vmem>>, vector<1x1x4x128xi32>
    %53 = vector.shape_cast %52 : vector<1x1x4x128xi32> to vector<4x128xi32>
    %54 = vector.shape_cast %51 : vector<4x128xi32> to vector<1x1x4x128xi32>
    tpu.vector_store %arg5[%c0_25, %c0_26, %c0_27, %c0_28], %54 {strides = array<i32>} : memref<1x1x4x128xi32, #tpu.memory_space<vmem>>, vector<1x1x4x128xi32>,
    return
  }
  func.func @transform_0(%arg0: i32, %arg1: i32, %arg2: i32) -> (i32, i32, i32, i32) {
    %c1_i32 = arith.constant 1 : i32
    %0 = arith.muli %arg1, %c1_i32 : i32
    %1 = arith.addi %0, %arg2 : i32
    %c0_i32 = arith.constant 0 : i32
    %c0_i32_0 = arith.constant 0 : i32
    %c0_i32_1 = arith.constant 0 : i32
    return %arg0, %c0_i32, %1, %c0_i32_0 : i32, i32, i32, i32
  }
  func.func @transform_1(%arg0: i32, %arg1: i32, %arg2: i32) -> (i32, i32, i32, i32) {
    %c1_i32 = arith.constant 1 : i32
    %0 = arith.muli %arg1, %c1_i32 : i32
    %1 = arith.addi %0, %arg2 : i32
    %c0_i32 = arith.constant 0 : i32
    %c0_i32_0 = arith.constant 0 : i32
    %c0_i32_1 = arith.constant 0 : i32
    return %arg0, %c0_i32, %1, %c0_i32_0 : i32, i32, i32, i32
  }
  func.func @transform_2(%arg0: i32, %arg1: i32, %arg2: i32) -> (i32, i32, i32, i32) {
    %c0_i32 = arith.constant 0 : i32
    %c0_i32_0 = arith.constant 0 : i32
    %c0_i32_1 = arith.constant 0 : i32
    return %arg0, %arg1, %c0_i32, %c0_i32_0 : i32, i32, i32, i32
  }
}

</mosaic_0001>

<bundles_post_ra>
// kernel: tpu_custom_call.1
= control target key start
LH: loop header
LB: loop body
LE: loop exit
PB: predicated region body
PF: predicated region fallthrough
CT: control target
= control target key end

     0   :  { %7 = vsyncpa [#allocation3], 0  ;;  %s1183_s0 = inlined_call_operand.hbm [shape: f32[2,4,32,128], index: 0, kind: input, shape index: {}]   ;;  %s1184_s1 = inlined_call_operand.hbm [shape: s8[2,1,32,128], index: 1, kind: input, shape index: {}]   ;;  %s1185_s2 = inlined_call_operand.hbm [shape: s32[2,1,4,128], index: 2, kind: output, shape index: {}]  }
   0x1   :  { %9 = vsyncpa [#allocation3 + $0x1], 0 }
   0x2   :  { %10 = vsyncpa [#allocation6], 0 }
   0x3   :  { %12 = vsyncpa [#allocation6 + $0x1], 0 }
   0x4   :  { %13 = vsyncpa [#allocation4], 0 }
   0x5   :  { %15 = vsyncpa [#allocation4 + $0x1], 0  ;;  %s793_s9 = smov 0   ;;  %s795_s10 = smov 0  }
   0x6   :  { %s797_s11 = smov 0   ;;  %s799_s12 = smov 0  }
   0x7   :  { %s801_s13 = smov 0   ;;  %s803_s14 = smov 0  }
   0x8 LB: > { %s524_s15 = sadd.s32 4294967295, %s770_s14   ;;  %s525_s16 = sadd.s32 4294967294, %s770_s14   ;;  %s770_s14 = sphi %s803_s14, %s21_s14   ;;  %s766_s13 = sphi %s801_s13, %s1252_s13   ;;  %s762_s12 = sphi %s799_s12, %s1251_s12   ;;  %s758_s11 = sphi %s797_s11, %s1250_s11   ;;  %s754_s10 = sphi %s795_s10, %s1249_s10   ;;  %s750_s9 = sphi %s793_s9, %s1248_s9  }
   0x9   : > { %s40_s17 = sadd.s32 1, %s766_s13  ;;  %s51_s18 = sadd.s32 1, %s758_s11 }
   0xa   : > { %p42_p0 = scmp.ge.s32.totalorder %s40_s17, 2  ;;  %p58_p1 = scmp.ne.s32.totalorder %s758_s11, %s754_s10 }
   0xb   : > { %p59_p2 = scmp.eq.s32.totalorder %s770_s14, 0  ;;  %p64_p3 = scmp.ne.s32.totalorder %s754_s10, %s750_s9 }
   0xc   : > { %s1254_s17 = smov (%p42_p0, %s40_s17), 0  ;;  %p65_p5 = scmp.eq.s32.totalorder %s524_s15, 0 }
   0xd   : > { %p834_p4 = por %p59_p2, %p58_p1  ;;  %s46_s20 = ssub.s32 %s766_s13, %s1254_s17 }
   0xe   : > { %p120_p6 = scmp.eq.s32.totalorder %s524_s15, 1  ;;  %p49_p7 = scmp.eq.s32.totalorder %s46_s20, 0 }
   0xf   : > { %p840_p8 = por %p65_p5, %p64_p3  ;;  %p126_p10 = scmp.eq.s32.totalorder %s525_s16, 1 }
  0x10   : > { %p844_p9 = por %p120_p6, %p58_p1  ;;  %p571_p13 = scmp.lt.s32.totalorder %s770_s14, 2 }
  0x11   : > { %s1195_s21 = scalar_select %p840_p8, 1, 0 }
  0x12   : > { %s1196_s22 = scalar_select %p844_p9, 1, 0 }
  0x13   : > { %s849_s23 = scalar_select %p49_p7, %s758_s11, %s51_s18  }
  0x14   : > { %p851_p11 = por %p126_p10, %p64_p3  ;;  %s858_s25 = sand.u32 1, %s758_s11  }
  0x15   : > { %s528_s26 = sshll.u32 %s858_s25, 7  ;;  %s553_s27 = sshll.u32 %s766_s13, 11 }
  0x16   : > { %s1197_s24 = scalar_select %p851_p11, 1, 0 }
  0x17   : > { %s865_s30 = scalar_lea.hbm %s1183_s0, %s553_s27  ;;  %s150_s3 = scalar_lea.vmem [#allocation2], %s528_s26 }
  0x18   : > { %s160_s4 = sshll.u32 %s150_s3, 4  ;;  %p871_p0 = pnand %p571_p13, %p834_p4  ;;  %s867_s4 = int_to_ptr.vmem [resolvable:$true] %s160_s4 }
  0x19   : > { %s147_s6 = scalar_lea.sflag [#allocation3], %s858_s25  ;;  %s624_s7 = scalar_lea.hbm %s865_s30, 2048 }
  0x1a   : > { %p625_p2 = scmp.ne.s32.totalorder %s865_s30, %s624_s7  ;;  %p626_p3 = pneg %p871_p0 }
  0x1b   : > { %s629_s16 = scalar_lea.hbm %s1183_s0, 4096  ;;  %p630_p4 = scmp.lt.u32.totalorder %s865_s30, %s1183_s0 }
  0x1c   : > { %p627_p5 = pnand %p626_p3, %p625_p2  ;;  %p631_p7 = scmp.lt.u32.totalorder %s629_s16, %s624_s7 }
  0x1d   : > { %p633_p13 = scmp.lt.u32.totalorder %s624_s7, %s865_s30 }
  0x1e   : > { %p628_p6 = pneg %p627_p5  ;;  %p632_p10 = por %p631_p7, %p630_p4 }
  0x20   : > { %p634_p12 = por %p633_p13, %p632_p10 }
  0x22   : > { %p635_p1 = pnand %p634_p12, %p628_p6 }
  0x24   : > { %638 = shalt.err (!%p635_p1)
}
  0x25   : > { %s639_s20 = scalar_lea.vmem %s867_s4, 2048  ;;  %s772_s26 = smov [#allocation2]  }
  0x26   : > { %p640_p2 = scmp.ne.s32.totalorder %s867_s4, %s639_s20  ;;  %s644_s27 = sshll.u32 %s772_s26, 4  ;;  %s645_s27 = int_to_ptr.vmem [resolvable:$false] %s644_s27 }
  0x27   : > { %s646_s28 = scalar_lea.vmem %s645_s27, 4096  ;;  %p647_p9 = scmp.lt.s32.totalorder %s867_s4, %s645_s27 }
  0x28   : > { %p642_p5 = pnand %p640_p2, %p626_p3  ;;  %p648_p4 = scmp.lt.s32.totalorder %s646_s28, %s639_s20 }
  0x2a   : > { %p643_p11 = pneg %p642_p5  ;;  %p649_p7 = por %p648_p4, %p647_p9 }
  0x2c   : > { %p650_p10 = pnand %p649_p7, %p643_p11 }
  0x2e   : > { %653 = shalt.err (!%p650_p10)
}
  0x2f   : > { %s773_s29 = smov 128   ;;  %s774_s3 = smov 8  }
  0x30   : > { %563 = dma.hbm_to_vmem [thread:$0]  (!%p871_p0), %s865_s30, 2048, %s867_s4, %s147_s6, %s773_s29, %s773_s29, %s774_s3  }
  0x31   : > { %p188_p12 = scmp.lt.s32.totalorder %s770_s14, 3  ;;  %s531_s7 = sshll.u32 %s858_s25, 3 }
  0x32   : > { %s532_s8 = sshll.u32 %s766_s13, 7  ;;  %p1199_p9 = scmp.ge.s32.totalorder %s770_s14, 1 }
  0x33   : > { %s916_s19 = scalar_lea.hbm %s1184_s1, %s532_s8  ;;  %s174_s20 = scalar_lea.vmem [#allocation5], %s531_s7 }
  0x34   : > { %p909_p11 = pnand %p1199_p9, %p188_p12  ;;  %s183_s26 = sshll.u32 %s174_s20, 4  ;;  %s184_s26 = int_to_ptr.vmem [resolvable:$true] %s183_s26 }
  0x35   : > { %s171_s30 = scalar_lea.sflag [#allocation6], %s858_s25  ;;  %s654_s4 = scalar_lea.hbm %s916_s19, 128 }
  0x36   : > { %s1200_s15 = scalar_select %p909_p11, 1, 0 }
  0x37   : > { %p655_p1 = scmp.ne.s32.totalorder %s916_s19, %s654_s4  ;;  %s659_s28 = scalar_lea.hbm %s1184_s1, 256 }
  0x38   : > { %p660_p2 = scmp.lt.u32.totalorder %s916_s19, %s1184_s1  ;;  %p661_p5 = scmp.lt.u32.totalorder %s659_s28, %s654_s4 }
  0x39   : > { %p657_p6 = pnand %p655_p1, %p626_p3  ;;  %p663_p7 = scmp.lt.u32.totalorder %s654_s4, %s916_s19 }
  0x3a   : > { %p662_p4 = por %p661_p5, %p660_p2 }
  0x3b   : > { %p658_p13 = pneg %p657_p6 }
  0x3c   : > { %p664_p10 = por %p663_p7, %p662_p4 }
  0x3e   : > { %p665_p12 = pnand %p664_p10, %p658_p13 }
  0x40   : > { %668 = shalt.err (!%p665_p12)
}
  0x41   : > { %s669_s25 = scalar_lea.vmem %s184_s26, 128  ;;  %s775_s7 = smov [#allocation5]  }
  0x42   : > { %p670_p9 = scmp.ne.s32.totalorder %s184_s26, %s669_s25  ;;  %s674_s8 = sshll.u32 %s775_s7, 4  ;;  %s675_s8 = int_to_ptr.vmem [resolvable:$false] %s674_s8 }
  0x43   : > { %s676_s16 = scalar_lea.vmem %s675_s8, 256  ;;  %p677_p8 = scmp.lt.s32.totalorder %s184_s26, %s675_s8 }
  0x44   : > { %p672_p1 = pnand %p670_p9, %p626_p3  ;;  %p678_p11 = scmp.lt.s32.totalorder %s676_s16, %s669_s25 }
  0x46   : > { %p673_p6 = pneg %p672_p1  ;;  %p679_p2 = por %p678_p11, %p677_p8 }
  0x48   : > { %p680_p5 = pnand %p679_p2, %p673_p6 }
  0x4a   : > { %683 = shalt.err (!%p680_p5)
}
  0x4b   : > { %566 = dma.hbm_to_vmem [thread:$0]  (!%p871_p0), %s916_s19, 128, %s184_s26, %s171_s30  }
  0x4c   : > { %p1201_p13 = scmp.ne.s32.totalorder %s1200_s15, 0 }
  0x4d   : > { %s941_s18 = sand.u32 (!%p1201_p13), 1, %s754_s10   ;;  %p1202_p8 = scmp.ne.s32.totalorder (!%p1201_p13), %s1195_s21, 0 }
  0x4e   : > { %192 = sbr.rel (%p1201_p13) target bundleno = 160 (0xa0), region = 28  ;;  %s534_s20 = sshll.u32 (!%p1201_p13), %s941_s18, 7 }
  0x4f   : > { %s195_s4 = scalar_lea.sflag (!%p1201_p13), [#allocation3], %s941_s18  ;;  %s945_s6 = scalar_lea.vmem (!%p1201_p13), [#allocation2], %s534_s20 }
  0x55   : > { %737 = dma.done.wait (%p1202_p8), %s195_s4, 2048  }
  0x56   : > { %739 = vsyncadd (%p1202_p8), %s195_s4, 4294965248  ;;  %s535_s5 = sshll.u32 %s941_s18, 3  ;;  %s204_s15 = scalar_lea.sflag [#allocation6], %s941_s18 }
  0x57   : > { %s953_s19 = scalar_lea.vmem [#allocation5], %s535_s5 }
  0x58   : > { %741 = dma.done.wait (%p1202_p8), %s204_s15, 128  }
  0x59   : > { %743 = vsyncadd (%p1202_p8), %s204_s15, 4294967168  ;;  %s536_s26 = sshll.u32 %s941_s18, 2  ;;  %v776_v0 = vmov 0   ;;  %v246_v1 = vld [vmem:[%s945_s6] sm:$0xff]  ;;  %v247_v2 = vld [vmem:[%s945_s6 + $0x8] sm:$0xff]  ;;  %v1203_v13 = vmov 0 }
  0x5a   : > { %s960_s30 = scalar_lea.vmem [#allocation7], %s536_s26  ;;  %v248_v3 = vld [vmem:[%s945_s6 + $0x10] sm:$0xff]  ;;  %v249_v4 = vld [vmem:[%s945_s6 + $0x18] sm:$0xff]  ;;  %v537_v5 = vld [vmem:[%s945_s6 + $0x20] sm:$0xff]  ;;  %v1209_v17 = vmov 0  ;;  %v1211_v19 = vmov 0 }
  0x5b   : > { %240 = vst [vmem:[%s960_s30] sm:$0xf] %v776_v0  ;;  %v538_v6 = vld [vmem:[%s945_s6 + $0x28] sm:$0xff]  ;;  %v539_v7 = vld [vmem:[%s945_s6 + $0x30] sm:$0xff]  ;;  %v540_v8 = vld [vmem:[%s945_s6 + $0x38] sm:$0xff]  ;;  %vm255_vm0 = vcmp.ge.f32.partialorder %v246_v1, %v537_v5  ;;  %vm259_vm9 = vcmp.gt.f32.partialorder %v537_v5, %v246_v1  ;;  %v1222_v28 = vmov 0  ;;  %v1224_v30 = vmov 0 }
  0x5c   : > { %vm256_vm1 = vcmp.ge.f32.partialorder %v247_v2, %v538_v6  ;;  %v541_v9 = vld [vmem:[%s945_s6 + $0x40] sm:$0xff]  ;;  %v542_v10 = vld [vmem:[%s945_s6 + $0x48] sm:$0xff]  ;;  %v543_v11 = vld [vmem:[%s945_s6 + $0x50] sm:$0xff]  ;;  %vm257_vm2 = vcmp.ge.f32.partialorder %v248_v3, %v539_v7  ;;  %vm258_vm5 = vcmp.ge.f32.partialorder %v249_v4, %v540_v8  ;;  %vm260_vm12 = vcmp.gt.f32.partialorder %v538_v6, %v247_v2  ;;  %s550_s21 = sshll.u32 %s762_s12, 6  ;;  %s413_s27 = sshll.u32 %s960_s30, 4  ;;  %s1135_s27 = int_to_ptr.vmem [resolvable:$true] %s413_s27 }
  0x5d   : > { %v544_v12 = vld [vmem:[%s945_s6 + $0x58] sm:$0xff]  ;;  %vm268_vm3 = vcmp.ge.f32.partialorder %v246_v1, %v541_v9  ;;  %vm269_vm4 = vcmp.ge.f32.partialorder %v247_v2, %v542_v10  ;;  %vm270_vm6 = vcmp.ge.f32.partialorder %v248_v3, %v543_v11  ;;  %vm276_vm11 = vcmp.ge.f32.partialorder %v537_v5, %v541_v9  ;;  %v545_v16 = vld [vmem:[%s945_s6 + $0x60] sm:$0xff]  ;;  %v546_v18 = vld [vmem:[%s945_s6 + $0x68] sm:$0xff]  ;;  %s1133_s3 = scalar_lea.hbm %s1185_s2, %s550_s21  ;;  %s399_s25 = scalar_lea.sflag [#allocation4], %s941_s18 }
  0x5e   : > { %vm271_vm7 = vcmp.ge.f32.partialorder %v249_v4, %v544_v12  ;;  %vm976_vm8 = vmand %vm255_vm0, %vm268_vm3  ;;  %vm277_vm14 = vcmp.ge.f32.partialorder %v538_v6, %v542_v10  ;;  %vm261_vm15 = vcmp.gt.f32.partialorder %v539_v7, %v248_v3  ;;  %vm278_vm3 = vcmp.ge.f32.partialorder %v539_v7, %v543_v11  ;;  %v547_v20 = vld [vmem:[%s945_s6 + $0x70] sm:$0xff]  ;;  %v548_v22 = vld [vmem:[%s945_s6 + $0x78] sm:$0xff]  ;;  %s684_s7 = scalar_lea.vmem %s1135_s27, 64  ;;  %p1245_p3 = scmp.ne.s32.totalorder %s1196_s22, 0 }
  0x5f   : > { %v1204_v13 = vsel %vm976_vm8, 4294967295, %v1203_v13  ;;  %vm980_vm10 = vmand %vm256_vm1, %vm269_vm4  ;;  %vm262_vm1 = vcmp.gt.f32.partialorder %v540_v8, %v249_v4  ;;  %vm279_vm4 = vcmp.ge.f32.partialorder %v540_v8, %v544_v12  ;;  %v241_v23 = vld [vmem:[%s953_s19] sm:$0xff]  ;;  %v1227_v32 = vmov 0  ;;  %p685_p0 = scmp.ne.s32.totalorder %s1135_s27, %s684_s7  ;;  %s777_s12 = smov [#allocation7]  }
  0x60   : > { %vm984_vm13 = vmand %vm257_vm2, %vm270_vm6  ;;  %vm289_vm6 = vcmp.ge.f32.partialorder %v246_v1, %v545_v16  ;;  %v1019_v27 = vunpack.c.0.s8 %v241_v23  ;;  %v243_v29 = vunpack.c.1.s8 %v241_v23  ;;  %v1033_v31 = vunpack.c.2.s8 %v241_v23  ;;  %s688_s8 = sshll.u32 %s777_s12, 4  ;;  %s689_s8 = int_to_ptr.vmem [resolvable:$false] %s688_s8 }
  0x61   : > { %vm989_vm0 = vmand %vm258_vm5, %vm271_vm7  ;;  %vm290_vm7 = vcmp.ge.f32.partialorder %v247_v2, %v546_v18  ;;  %v1041_v33 = vunpack.c.3.s8 %v241_v23  ;;  %v1232_v35 = vmov 0  ;;  %v1234_v36 = vmov 0  ;;  %p686_p11 = pnand %p685_p0, %p1245_p3  ;;  %s690_s16 = scalar_lea.vmem %s689_s8, 128 }
  0x62   : > { %v1210_v17 = vsel %vm989_vm0, 4294967295, %v1209_v17  ;;  %vm994_vm8 = vmand %vm259_vm9, %vm276_vm11  ;;  %vm291_vm9 = vcmp.ge.f32.partialorder %v248_v3, %v547_v20  ;;  %vm292_vm11 = vcmp.ge.f32.partialorder %v249_v4, %v548_v22  ;;  %v1236_v37 = vmov 0  ;;  %p691_p7 = scmp.lt.s32.totalorder %s1135_s27, %s689_s8  ;;  %p692_p10 = scmp.lt.s32.totalorder %s690_s16, %s684_s7 }
  0x63   : > { %v1212_v19 = vsel %vm994_vm8, 4294967295, %v1211_v19  ;;  %vm999_vm2 = vmand %vm260_vm12, %vm277_vm14  ;;  %vm1219_vm8 = vnez %v1204_v13  ;;  %p687_p4 = pneg %p686_p11 }
  0x64   : > { %vm1005_vm5 = vmand %vm261_vm15, %vm278_vm3  ;;  %vm297_vm15 = vcmp.ge.f32.partialorder %v537_v5, %v545_v16  ;;  %p693_p12 = por %p692_p10, %p691_p7 }
  0x65   : > { %vm1009_vm0 = vmand %vm262_vm1, %vm279_vm4  ;;  %vm1226_vm1 = vnez %v1210_v17 }
  0x66   : > { %vm1015_vm12 = vmand %vm1219_vm8, %vm289_vm6  ;;  %vm298_vm8 = vcmp.ge.f32.partialorder %v538_v6, %v546_v18  ;;  %vm300_vm6 = vcmp.ge.f32.partialorder %v540_v8, %v548_v22  ;;  %p694_p9 = pnand %p693_p12, %p687_p4 }
  0x67   : > { %vm1023_vm14 = vmand %vm980_vm10, %vm290_vm7  ;;  %vm299_vm10 = vcmp.ge.f32.partialorder %v539_v7, %v547_v20  ;;  %vm1229_vm7 = vnez %v1212_v19 }
  0x68   : > { %v1223_v28 = vsel %vm1023_vm14, 4294967295, %v1222_v28  ;;  %vm1029_vm3 = vmand %vm984_vm13, %vm291_vm9  ;;  %vm305_vm9 = vcmp.eq.s32.totalorder %v1019_v27, 0 }
  0x69   : > { %v1225_v30 = vsel %vm1029_vm3, 4294967295, %v1224_v30  ;;  %vm1037_vm4 = vmand %vm1226_vm1, %vm292_vm11  ;;  %vm306_vm1 = vcmp.eq.s32.totalorder %v243_v29, 0 }
  0x6a   : > { %v1228_v32 = vsel %vm1037_vm4, 4294967295, %v1227_v32  ;;  %vm1045_vm14 = vmand %vm1229_vm7, %vm297_vm15 }
  0x6b   : > { %vm1051_vm13 = vmand %vm999_vm2, %vm298_vm8  ;;  %vm307_vm2 = vcmp.eq.s32.totalorder %v1033_v31, 0  ;;  %vm308_vm8 = vcmp.eq.s32.totalorder %v1041_v33, 0 }
  0x6c   : > { %v1233_v35 = vsel %vm1051_vm13, 4294967295, %v1232_v35  ;;  %vm1058_vm11 = vmand %vm1005_vm5, %vm299_vm10  ;;  %vm1238_vm13 = vnez %v1223_v28  ;;  %vm317_vm10 = vcmp.eq.s32.totalorder %v1019_v27, 1  ;;  %v395_v28 = vld [vmem:[%s960_s30] sm:$0xf] }
  0x6d   : > { %v1235_v36 = vsel %vm1058_vm11, 4294967295, %v1234_v36  ;;  %vm1064_vm15 = vmand %vm1009_vm0, %vm300_vm6  ;;  %vm318_vm6 = vcmp.eq.s32.totalorder %v243_v29, 1 }
  0x6e   : > { %v1237_v37 = vsel %vm1064_vm15, 4294967295, %v1236_v37  ;;  %vm309_vm7 = vmand %vm1015_vm12, %vm305_vm9  ;;  %vm319_vm9 = vcmp.eq.s32.totalorder %v1033_v31, 1 }
  0x6f   : > { %vm310_vm5 = vmand %vm1238_vm13, %vm306_vm1  ;;  %v313_v38 = vsel %vm309_vm7, 1, %v776_v0  ;;  %vm320_vm1 = vcmp.eq.s32.totalorder %v1041_v33, 1 }
  0x70   : > { %vm311_vm0 = vmand %vm1029_vm3, %vm307_vm2  ;;  %v314_v39 = vsel %vm310_vm5, 1, %v776_v0  ;;  %vm1239_vm2 = vnez %v1233_v35  ;;  %vm329_vm5 = vcmp.eq.s32.totalorder %v1019_v27, 2 }
  0x71   : > { %vm312_vm15 = vmand %vm1037_vm4, %vm308_vm8  ;;  %v315_v40 = vsel %vm311_vm0, 1, %v776_v0  ;;  %v353_v41 = vadd.s32 %v314_v39, %v313_v38  ;;  %vm330_vm0 = vcmp.eq.s32.totalorder %v243_v29, 2 }
  0x72   : > { %v316_v42 = vsel %vm312_vm15, 1, %v776_v0  ;;  %vm321_vm7 = vmand %vm1045_vm14, %vm317_vm10  ;;  %vm1240_vm15 = vnez %v1237_v37  ;;  %vm331_vm10 = vcmp.eq.s32.totalorder %v1033_v31, 2 }
  0x73   : > { %vm322_vm3 = vmand %vm1239_vm2, %vm318_vm6  ;;  %v325_v43 = vsel %vm321_vm7, 1, %v776_v0  ;;  %v354_v44 = vadd.s32 %v316_v42, %v315_v40  ;;  %vm332_vm6 = vcmp.eq.s32.totalorder %v1041_v33, 2 }
  0x74   : > { %vm323_vm8 = vmand %vm1058_vm11, %vm319_vm9  ;;  %v326_v45 = vsel %vm322_vm3, 1, %v776_v0  ;;  %vm341_vm9 = vcmp.eq.s32.totalorder %v1019_v27, 3  ;;  %vm1242_vm11 = vnez %v1228_v32 }
  0x75   : > { %vm324_vm4 = vmand %vm1240_vm15, %vm320_vm1  ;;  %v327_v46 = vsel %vm323_vm8, 1, %v776_v0  ;;  %v355_v47 = vadd.s32 %v354_v44, %v353_v41  ;;  %v362_v48 = vadd.s32 %v326_v45, %v325_v43  ;;  %vm1241_vm1 = vnez %v1225_v30 }
  0x76   : > { %v328_v49 = vsel %vm324_vm4, 1, %v776_v0  ;;  %vm333_vm7 = vmand %vm1015_vm12, %vm329_vm5  ;;  %vm342_vm4 = vcmp.eq.s32.totalorder %v243_v29, 3  ;;  %vm343_vm15 = vcmp.eq.s32.totalorder %v1033_v31, 3 }
  0x77   : > { %vm334_vm3 = vmand %vm1238_vm13, %vm330_vm0  ;;  %v337_v50 = vsel %vm333_vm7, 1, %v776_v0  ;;  %v356_v51 = vrot.slane %v355_v47, 4  ;;  %v363_v52 = vadd.s32 %v328_v49, %v327_v46  ;;  %vm344_vm13 = vcmp.eq.s32.totalorder %v1041_v33, 3 }
  0x78   : > { %vm335_vm8 = vmand %vm1241_vm1, %vm331_vm10  ;;  %v338_v53 = vsel %vm334_vm3, 1, %v776_v0 }
  0x79   : > { %vm336_vm12 = vmand %vm1242_vm11, %vm332_vm6  ;;  %v339_v54 = vsel %vm335_vm8, 1, %v776_v0  ;;  %v357_v55 = vadd.s32 %v356_v51, %v355_v47  ;;  %v364_v56 = vadd.s32 %v363_v52, %v362_v48  ;;  %v371_v57 = vadd.s32 %v338_v53, %v337_v50 }
  0x7a   : > { %v340_v58 = vsel %vm336_vm12, 1, %v776_v0  ;;  %vm345_vm5 = vmand %vm1045_vm14, %vm341_vm9  ;;  %vm1243_vm11 = vnez %v1235_v36  ;;  %vm1244_vm6 = vnez %v1237_v37  ;;  %vm389_vm14 = vcmask 1040384  }
  0x7b   : > { %vm346_vm0 = vmand %vm1239_vm2, %vm342_vm4  ;;  %v349_v59 = vsel %vm345_vm5, 1, %v776_v0  ;;  %v358_v60 = vrot.slane %v357_v55, 2  ;;  %v365_v61 = vrot.slane %v364_v56, 4  ;;  %v372_v62 = vadd.s32 %v340_v58, %v339_v54 }
  0x7c   : > { %vm347_vm10 = vmand %vm1243_vm11, %vm343_vm15  ;;  %v350_v63 = vsel %vm346_vm0, 1, %v776_v0  ;;  %vm391_vm2 = vcmask 1041408   ;;  %vm393_vm15 = vcmask 1042432  }
  0x7d   : > { %vm348_vm7 = vmand %vm1244_vm6, %vm344_vm13  ;;  %v351_v1 = vsel %vm347_vm10, 1, %v776_v0  ;;  %v359_v2 = vadd.s32 %v358_v60, %v357_v55  ;;  %v366_v3 = vadd.s32 %v365_v61, %v364_v56  ;;  %v373_v4 = vadd.s32 %v372_v62, %v371_v57 }
  0x7e   : > { %v352_v5 = vsel %vm348_vm7, 1, %v776_v0  ;;  %v380_v6 = vadd.s32 %v350_v63, %v349_v59 }
  0x7f   : > { %v367_v7 = vrot.slane %v366_v3, 2  ;;  %v374_v8 = vrot.slane %v373_v4, 4  ;;  %v381_v9 = vadd.s32 %v352_v5, %v351_v1  ;;  %v360_v10 = vrot.slane %v359_v2, 1 }
  0x81   : > { %v368_v11 = vadd.s32 %v367_v7, %v366_v3  ;;  %v375_v12 = vadd.s32 %v374_v8, %v373_v4  ;;  %v382_v13 = vadd.s32 %v381_v9, %v380_v6  ;;  %v361_v17 = vadd.s32 %v360_v10, %v359_v2 }
  0x83   : > { %v369_v14 = vrot.slane %v368_v11, 1  ;;  %v376_v15 = vrot.slane %v375_v12, 2  ;;  %v383_v16 = vrot.slane %v382_v13, 4 }
  0x85   : > { %v370_v18 = vadd.s32 %v369_v14, %v368_v11  ;;  %v377_v19 = vadd.s32 %v376_v15, %v375_v12  ;;  %v384_v20 = vadd.s32 %v383_v16, %v382_v13 }
  0x87   : > { %v378_v0 = vrot.slane %v377_v19, 1  ;;  %v385_v21 = vrot.slane %v384_v20, 2  ;;  %v390_v24 = vsel %vm389_vm14, %v361_v17, %v370_v18 }
  0x89   : > { %v379_v22 = vadd.s32 %v378_v0, %v377_v19  ;;  %v386_v23 = vadd.s32 %v385_v21, %v384_v20 }
  0x8b   : > { %v387_v25 = vrot.slane %v386_v23, 1  ;;  %v392_v26 = vsel %vm391_vm2, %v390_v24, %v379_v22 }
  0x8d   : > { %v388_v27 = vadd.s32 %v387_v25, %v386_v23 }
  0x8f   : > { %v394_v29 = vsel %vm393_vm15, %v392_v26, %v388_v27 }
  0x90   : > { %v396_v30 = vadd.s32 %v395_v28, %v394_v29 }
  0x92   : > { %397 = vst [vmem:[%s960_s30] sm:$0xf] %v396_v30 }
  0x93   : > { %697 = shalt.err (!%p694_p9)
}
  0x94   : > { %s698_s18 = scalar_lea.hbm %s1133_s3, 64  ;;  %s702_s6 = scalar_lea.hbm %s1185_s2, 128 }
  0x95   : > { %p699_p1 = scmp.ne.s32.totalorder %s1133_s3, %s698_s18  ;;  %p703_p5 = scmp.lt.u32.totalorder %s1133_s3, %s1185_s2 }
  0x96   : > { %p704_p13 = scmp.lt.u32.totalorder %s702_s6, %s698_s18  ;;  %p706_p0 = scmp.lt.u32.totalorder %s698_s18, %s1133_s3 }
  0x97   : > { %p700_p6 = pnand %p699_p1, %p1245_p3 }
  0x98   : > { %p705_p8 = por %p704_p13, %p703_p5 }
  0x99   : > { %p701_p2 = pneg %p700_p6 }
  0x9a   : > { %p707_p11 = por %p706_p0, %p705_p8 }
  0x9c   : > { %p708_p4 = pnand %p707_p11, %p701_p2 }
  0x9e   : > { %711 = shalt.err (!%p708_p4)
}
  0x9f   : > { %558 = dma.vmem_to_hbm [thread:$0]  (%p1245_p3), %s1135_s27, 64, %s1133_s3, %s399_s25  }
  0xa0 PF: > { %s425_s19 = sand.u32 1, %s750_s9   ;;  %p1246_p7 = scmp.ne.s32.totalorder %s1197_s24, 0 }
  0xa1   : > { %p1247_p10 = scmp.ge.s32.totalorder %s770_s14, 2  ;;  %s426_s26 = scalar_lea.sflag [#allocation4], %s425_s19 }
  0xa3   : > { %p568_p12 = pnand %p1247_p10, %p1246_p7 }
  0xa5   : > { %745 = dma.done.wait (!%p568_p12), %s426_s26, 64  }
  0xa6   : > { %747 = vsyncadd (!%p568_p12), %s426_s26, 4294967232  ;;  %s21_s14 = sadd.s32 1, %s770_s14   ;;  %s1248_s9 = smov %s754_s10 }
  0xa7   : > { %p18_p9 = scmp.ge.s32.totalorder %s21_s14, 4   ;;  %s1249_s10 = smov %s758_s11 }
  0xa8   : > { %s1250_s11 = smov %s849_s23  ;;  %s1251_s12 = smov %s766_s13 }
  0xa9   : > { %s1252_s13 = smov %s1254_s17  ;;  %20 = sbr.rel (!%p18_p9) target bundleno = 8 (0x8), region = 93 }
  0xb0   :  { %431 = vsyncpa [#allocation3], 1 }
  0xb1   :  { %433 = vsyncpa [#allocation3 + $0x1], 1 }
  0xb2   :  { %434 = vsyncpa [#allocation6], 1 }
  0xb3   :  { %436 = vsyncpa [#allocation6 + $0x1], 1 }
  0xb4   :  { %437 = vsyncpa [#allocation4], 1 }
  0xb5   :  { %439 = vsyncpa [#allocation4 + $0x1], 1 }

</bundles_post_ra>
